<compile_context>
chip_gen: v7x
topology: tpu7x:2x2x1
jax: 0.10.0
libtpu: 0.0.40
codegen_flags: <defaults>
</compile_context>

<pallas_src>
import jax
import jax.numpy as jnp
from jax.experimental import pallas as pl
from jax.experimental.pallas import tpu as pltpu

_LANES = 512                    # lane-dense last dim (multiple of 128)
_MAX_BLOCK_ROWS = 1024          # 1024x512 f32 = 2 MiB/block; 8 MiB double-buffered in+out
_MIN_PALLAS_ELEMENTS = 1 << 20  # below this, XLA fusion beats a custom-call launch


def _affine_ref(x):
    """Pure-XLA fallback with the same folded arithmetic as the kernel."""
    return (x * 2.0 + 10.0) / 5.0


def _ptmodule_kernel(x_ref, o_ref):
    # ((x*2) + 0 + 1 + 2 + 3 + 4) / 5  folded to  (2*x + 10) / 5.
    # 1 mul + 1 add + 1 div per element; trivially hidden behind the HBM stream.
    o_ref[...] = ((x_ref[...] * 2.0 + 10.0) / 5.0).astype(o_ref.dtype)


def _run_pallas_slab(x2d):
    """Apply the kernel to a lane-dense (rows, _LANES) slab."""
    rows = x2d.shape[0]
    itemsize = jnp.dtype(x2d.dtype).itemsize

    block_rows = min(_MAX_BLOCK_ROWS, rows)
    # v7x megacore: keep at least 2 grid steps when there's enough work so the
    # "parallel" axis can actually be sharded across both TensorCores.
    if rows >= 16 and pl.cdiv(rows, block_rows) < 2:
        block_rows = max(8, ((pl.cdiv(rows, 2) + 7) // 8) * 8)

    grid = (pl.cdiv(rows, block_rows),)  # ragged last block OK: elementwise op,
    n_elems = rows * _LANES              # boundary writes are masked by Pallas.

    return pl.pallas_call(
        _ptmodule_kernel,
        out_shape=jax.ShapeDtypeStruct((rows, _LANES), x2d.dtype),
        grid=grid,
        # Full-width lane blocks over the row-major slab -> each auto-DMA is one
        # contiguous HBM stream, stores are unmasked vst.
        in_specs=[pl.BlockSpec((block_rows, _LANES), lambda i: (i, 0))],
        out_specs=pl.BlockSpec((block_rows, _LANES), lambda i: (i, 0)),
        compiler_params=pltpu.CompilerParams(
            dimension_semantics=("parallel",),
            vmem_limit_bytes=32 * 1024 * 1024,
        ),
        cost_estimate=pl.CostEstimate(
            flops=3 * n_elems,
            transcendentals=0,
            bytes_accessed=2 * n_elems * itemsize,
        ),
    )(x2d)


def ptmodule_forward(x, *, min_pallas_elements=_MIN_PALLAS_ELEMENTS):
    """x: float array of any shape (e.g. NCHW). Returns ((x*2)+0+1+2+3+4)/5."""
    n = x.size
    if n < min_pallas_elements or n < _LANES:
        # Tiny tensors: custom-call launch + reshapes dominate; let XLA fuse.
        return _affine_ref(x)

    orig_shape = x.shape
    flat = x.reshape(-1)
    n_aligned = (n // _LANES) * _LANES

    if n_aligned == n:
        # Fast path: lane-aligned, zero wrapper copies (contiguous reshape only).
        out2d = _run_pallas_slab(flat.reshape(n // _LANES, _LANES))
        return out2d.reshape(orig_shape)

    # Ragged tail (< _LANES elements): Pallas on the aligned prefix, XLA on the
    # tail — no O(n) pad-to-block round trips.
    head2d = _run_pallas_slab(flat[:n_aligned].reshape(n_aligned // _LANES, _LANES))
    tail = _affine_ref(flat[n_aligned:])
    out_flat = jnp.concatenate([head2d.reshape(-1), tail])
    return out_flat.reshape(orig_shape)


def _torch_ref(x):
    """Bit-faithful JAX transcription of the PyTorch module's forward."""
    out = x * 2.0
    for i in range(5):
        out = out + float(i)
    return out / 5.0


if __name__ == "__main__":
    key = jax.random.PRNGKey(0)
    k_small, k_big, k_ragged = jax.random.split(key, 3)

    # 1) Small NCHW input (batch=2, channels=4, 16x16) — default path (XLA fallback).
    x_small = jax.random.normal(k_small, (2, 4, 16, 16), dtype=jnp.float32)
    out_fallback = jax.block_until_ready(ptmodule_forward(x_small))
    assert out_fallback.shape == x_small.shape and out_fallback.dtype == x_small.dtype
    assert jnp.allclose(out_fallback, _torch_ref(x_small), atol=1e-6, rtol=1e-6)

    # 2) Same small input forced through the Pallas kernel (2048 elems, lane-aligned).
    out_pallas_small = jax.block_until_ready(
        ptmodule_forward(x_small, min_pallas_elements=0))
    assert out_pallas_small.shape == x_small.shape
    assert jnp.allclose(out_pallas_small, _torch_ref(x_small), atol=1e-6, rtol=1e-6)

    # 3) Large aligned input — the production Pallas path (block_rows=1024, grid>=2).
    x_big = jax.random.normal(k_big, (8, 64, 64, 64), dtype=jnp.float32)  # 2M elems
    out_big = jax.block_until_ready(ptmodule_forward(x_big))
    assert out_big.shape == x_big.shape
    assert jnp.allclose(out_big, _torch_ref(x_big), atol=1e-6, rtol=1e-6)

    # 4) Unaligned input — exercises the Pallas prefix + XLA tail path.
    x_ragged = jax.random.normal(k_ragged, (3, 5, 37, 41), dtype=jnp.float32)
    out_ragged = jax.block_until_ready(
        ptmodule_forward(x_ragged, min_pallas_elements=0))
    assert out_ragged.shape == x_ragged.shape
    assert jnp.allclose(out_ragged, _torch_ref(x_ragged), atol=1e-6, rtol=1e-6)

    print("KERNEL_OK")
</pallas_src>

<mosaic_0001>
module attributes {stable_mosaic.version = 11 : i64} {
  func.func @_ptmodule_kernel(%arg0: i32, %arg1: memref<4x512xf32, #tpu.memory_space<vmem>>, %arg2: memref<4x512xf32, #tpu.memory_space<vmem>>) attributes {dimension_semantics = [#tpu.dimension_semantics<parallel>], iteration_bounds = array<i64: 1>, scalar_prefetch = 0 : i64, scratch_operands = 0 : i64, tpu.core_type = #tpu.core_type<tc>, window_params = [{transform_indices = @transform_0, window_bounds = array<i64: 4, 512>}, {transform_indices = @transform_1, window_bounds = array<i64: 4, 512>}]} {
    %c0 = arith.constant 0 : index
    %c0_0 = arith.constant 0 : index
    %0 = vector.load %arg1[%c0, %c0_0] : memref<4x512xf32, #tpu.memory_space<vmem>>, vector<4x512xf32>
    %cst = arith.constant 2.000000e+00 : f32
    %1 = vector.broadcast %cst : f32 to vector<4x512xf32>
    %2 = arith.mulf %0, %1 : vector<4x512xf32>
    %cst_1 = arith.constant 1.000000e+01 : f32
    %3 = vector.broadcast %cst_1 : f32 to vector<4x512xf32>
    %4 = arith.addf %2, %3 : vector<4x512xf32>
    %cst_2 = arith.constant 5.000000e+00 : f32
    %5 = vector.broadcast %cst_2 : f32 to vector<4x512xf32>
    %6 = arith.divf %4, %5 : vector<4x512xf32>
    %c0_3 = arith.constant 0 : index
    %c0_4 = arith.constant 0 : index
    %7 = vector.load %arg2[%c0_3, %c0_4] : memref<4x512xf32, #tpu.memory_space<vmem>>, vector<4x512xf32>
    tpu.vector_store %arg2[%c0_3, %c0_4], %6 {strides = array<i32>} : memref<4x512xf32, #tpu.memory_space<vmem>>, vector<4x512xf32>,
    return
  }
  func.func @transform_0(%arg0: i32) -> (i32, i32) {
    %c0_i32 = arith.constant 0 : i32
    %c0_i32_0 = arith.constant 0 : i32
    return %arg0, %c0_i32 : i32, i32
  }
  func.func @transform_1(%arg0: i32) -> (i32, i32) {
    %c0_i32 = arith.constant 0 : i32
    %c0_i32_0 = arith.constant 0 : i32
    return %arg0, %c0_i32 : i32, i32
  }
}

</mosaic_0001>

<bundles_post_ra>
// kernel: tpu_custom_call.1
= control target key start
LH: loop header
LB: loop body
LE: loop exit
PB: predicated region body
PF: predicated region fallthrough
CT: control target
= control target key end

     0   :  { %6 = vsyncpa [#allocation3], 0  ;;  %s133_s0 = inlined_call_operand.hbm [shape: f32[4,512], index: 0, kind: input, shape index: {}]   ;;  %s134_s1 = inlined_call_operand.hbm [shape: f32[4,512], index: 1, kind: output, shape index: {}]  }
   0x1   :  { %7 = vsyncpa [#allocation4], 0  ;;  %s97_s6 = smov [#allocation2]   ;;  %s49_s10 = scalar_lea.hbm %s133_s0, 256 }
   0x2   :  { %s14_s7 = sshll.u32 %s97_s6, 4  ;;  %p50_p0 = scmp.ne.s32.totalorder %s133_s0, %s49_s10  ;;  %s15_s7 = int_to_ptr.vmem [resolvable:$true] %s14_s7 }
   0x3   :  { %p53_p1 = scmp.lt.u32.totalorder %s49_s10, %s133_s0 }
   0x5   :  { %p55_p2 = pnand %p53_p1, %p50_p0 }
   0x7   :  { %58 = shalt.err (!%p55_p2)
}
   0x8   :  { %s59_s15 = scalar_lea.vmem %s15_s7, 256  ;;  %p64_p4 = scmp.lt.s32.totalorder %s15_s7, %s15_s7 }
   0x9   :  { %p60_p3 = scmp.ne.s32.totalorder %s15_s7, %s59_s15  ;;  %p65_p5 = scmp.lt.s32.totalorder %s59_s15, %s59_s15 }
   0xb   :  { %p66_p6 = por %p65_p5, %p64_p4 }
   0xd   :  { %p67_p7 = pnand %p66_p6, %p60_p3 }
   0xf   :  { %70 = shalt.err (!%p67_p7)
}
  0x10   :  { %17 = dma.hbm_to_vmem [thread:$0]  %s133_s0, 256, %s15_s7, [#allocation3]  }
  0x11   :  { %93 = dma.done.wait [#allocation3], 256  }
  0x12   :  { %94 = vsyncadd [#allocation3], 4294967040  ;;  %v21_v0 = vld [vmem:[#allocation2] sm:$0xff]  ;;  %v22_v1 = vld [vmem:[#allocation2 + $0x8] sm:$0xff]  ;;  %s98_s18 = smov [#allocation5]  }
  0x13   :  { %v23_v2 = vmul.f32 2.0, %v21_v0  ;;  %v24_v3 = vmul.f32 2.0, %v22_v1  ;;  %s38_s19 = sshll.u32 %s98_s18, 4  ;;  %s39_s19 = int_to_ptr.vmem [resolvable:$true] %s38_s19 }
  0x14   :  { %s71_s20 = scalar_lea.vmem %s39_s19, 256  ;;  %p76_p9 = scmp.lt.s32.totalorder %s39_s19, %s39_s19 }
  0x15   :  { %v25_v4 = vadd.f32 10.0, %v23_v2  ;;  %v26_v5 = vadd.f32 10.0, %v24_v3  ;;  %p72_p8 = scmp.ne.s32.totalorder %s39_s19, %s71_s20  ;;  %p77_p10 = scmp.lt.s32.totalorder %s71_s20, %s71_s20 }
  0x17   :  { %v28_v6 = vmul.f32 0.2, %v25_v4  ;;  %v29_v7 = vmul.f32 0.2, %v26_v5  ;;  %p78_p11 = por %p77_p10, %p76_p9 }
  0x19   :  { %30 = vst [vmem:[#allocation5] sm:$0xff] %v28_v6  ;;  %31 = vst [vmem:[#allocation5 + $0x8] sm:$0xff] %v29_v7  ;;  %p79_p12 = pnand %p78_p11, %p72_p8 }
  0x1b   :  { %82 = shalt.err (!%p79_p12)
}
  0x1c   :  { %s83_s22 = scalar_lea.hbm %s134_s1, 256 }
  0x1d   :  { %p84_p13 = scmp.ne.s32.totalorder %s134_s1, %s83_s22  ;;  %p87_p0 = scmp.lt.u32.totalorder %s83_s22, %s134_s1 }
  0x1f   :  { %p89_p1 = pnand %p87_p0, %p84_p13 }
  0x21   :  { %92 = shalt.err (!%p89_p1)
}
  0x22   :  { %41 = dma.vmem_to_hbm [thread:$0]  %s39_s19, 256, %s134_s1, [#allocation4]  }
  0x23   :  { %95 = dma.done.wait [#allocation4], 256  }
  0x24   :  { %96 = vsyncadd [#allocation4], 4294967040 }
  0x25   :  { %45 = vsyncpa [#allocation3], 1 }
  0x26   :  { %46 = vsyncpa [#allocation4], 1 }

</bundles_post_ra>
